<compile_context>
chip_gen: v5e
topology: v5e:2x2
jax: 0.10.0
libtpu: 0.0.40
codegen_flags: <defaults>
</compile_context>

<pallas_src>
import jax
import jax.numpy as jnp
from jax.experimental import pallas as pl
from jax.experimental.pallas import tpu as pltpu

_LANE = 128
_MAX_WIDTH_VREGS = 64            # hard cap: width <= 8192 lanes
_PREF_WIDTH_VREGS = 16           # preferred cap: width <= 2048 lanes
_TARGET_BLOCK_BYTES_DEFAULT = 4 * 1024 * 1024
_VMEM_LIMIT_BYTES_DEFAULT = 32 * 1024 * 1024
_PIPELINE_2STEP_BYTES = 256 * 1024        # >= this -> at least 2 grid steps
_PIPELINE_4STEP_BYTES = 2 * 1024 * 1024   # >= this -> at least 4 grid steps

# Primitives we accept as "elementwise" (safe under flatten-and-tile).
_ELEMENTWISE_PRIMS = frozenset({
    "add", "sub", "mul", "div", "rem", "neg", "abs", "sign", "max", "min",
    "pow", "integer_pow", "exp", "exp2", "expm1", "log", "log1p",
    "tanh", "logistic", "sin", "cos", "tan", "asin", "acos", "atan", "atan2",
    "sinh", "cosh", "asinh", "acosh", "atanh",
    "sqrt", "rsqrt", "cbrt", "square", "erf", "erfc", "erf_inv",
    "floor", "ceil", "round", "clamp", "nextafter", "is_finite",
    "and", "or", "xor", "not", "shift_left", "shift_right_logical",
    "shift_right_arithmetic",
    "eq", "ne", "lt", "le", "gt", "ge", "select_n",
    "convert_element_type", "broadcast_in_dim", "copy",
})
_TRANSCENDENTAL_PRIMS = frozenset({
    "exp", "exp2", "expm1", "log", "log1p", "tanh", "logistic",
    "sin", "cos", "tan", "asin", "acos", "atan", "atan2",
    "sinh", "cosh", "asinh", "acosh", "atanh",
    "sqrt", "rsqrt", "cbrt", "erf", "erfc", "erf_inv", "pow",
})


def _min_sublanes(dtype) -> int:
    """Minimum second-to-last tile dim for this dtype's packed vreg layout."""
    itemsize = jnp.dtype(dtype).itemsize
    return {4: 8, 2: 16, 1: 32}.get(itemsize, 8)


def _analyze_func(func, x):
    """Validate the elementwise contract; return (ok, out_dtype, eqns, transc).

    ok=False means: fall back to plain JAX (non-elementwise / reshaping /
    reducing lambdas, funcs capturing non-scalar arrays, or anything we can
    not trace safely).
    """
    try:
        out_full = jax.eval_shape(func, jax.ShapeDtypeStruct(x.shape, x.dtype))
    except Exception:
        return False, None, 0, 0
    if not hasattr(out_full, "shape") or out_full.shape != x.shape:
        return False, None, 0, 0
    out_dtype = out_full.dtype
    try:
        probe = jnp.zeros((8, _LANE), x.dtype)
        closed = jax.make_jaxpr(func)(probe)
        # Captured non-scalar arrays would be misaligned against the
        # flattened, tiled view -> not tile-wise elementwise.
        if any(getattr(c, "ndim", 0) > 0 for c in closed.consts):
            return False, out_dtype, 0, 0
        n_eqns = 0
        n_trans = 0
        for eqn in closed.jaxpr.eqns:
            name = eqn.primitive.name
            if name not in _ELEMENTWISE_PRIMS:
                return False, out_dtype, 0, 0
            n_eqns += 1
            if name in _TRANSCENDENTAL_PRIMS:
                n_trans += 1
    except Exception:
        return False, out_dtype, 0, 0
    return True, out_dtype, max(n_eqns, 1), n_trans


def _choose_layout(m, min_sub):
    """Pick (rows, width) with rows * width == m * 128.

    Prefer rows a multiple of the sublane quantum (full (8,128)-class vregs)
    and width a moderate multiple of 128 -- e.g. 2048 f32 elems -> (8, 256),
    not (1, 2048).
    """
    cands = [w for w in range(1, min(m, _MAX_WIDTH_VREGS) + 1) if m % w == 0]
    good = [w for w in cands if (m // w) % min_sub == 0]
    if good:
        pref = [w for w in good if w <= _PREF_WIDTH_VREGS]
        w = max(pref) if pref else min(good)
    else:
        tall = [w for w in cands if (m // w) >= min_sub]
        w = max(tall) if tall else 1
    return m // w, w * _LANE


def _generation_params():
    """(target block bytes, vmem_limit_bytes), tuned per TPU generation."""
    target_block = _TARGET_BLOCK_BYTES_DEFAULT
    vmem_limit = _VMEM_LIMIT_BYTES_DEFAULT
    try:
        info = pltpu.get_tpu_info()
        vmem_cap = getattr(info, "vmem_capacity_bytes", None)
        if vmem_cap is not None and vmem_cap <= 80 * 1024 * 1024:
            # v7x-class: 64 MiB VMEM/TC but ~3.2 TB/s HBM -> larger blocks
            # amortize the ~0.35 us per-grid-step overhead; double-buffered
            # in+out = 24 MiB still leaves headroom under a 48 MiB limit.
            target_block = 6 * 1024 * 1024
            vmem_limit = 48 * 1024 * 1024
    except Exception:
        pass
    return target_block, vmem_limit


def _choose_block_rows(rows, width, in_isize, out_isize, min_sub, target_block_bytes):
    if rows <= min_sub:
        return rows  # single block == full array dims (always legal)
    bytes_per_row = width * max(in_isize, out_isize)
    block_rows = max(min_sub,
                     (target_block_bytes // bytes_per_row) // min_sub * min_sub)
    block_rows = min(block_rows, rows // min_sub * min_sub)
    # Keep enough grid steps for DMA/compute overlap (double buffering) and so
    # the "parallel" grid axis feeds both v7x TensorCores; >= 4 steps once the
    # tensor is big enough that pipelining pays for the per-step overhead.
    total_bytes = rows * width * (in_isize + out_isize)
    if total_bytes >= _PIPELINE_4STEP_BYTES:
        min_steps = 4
    elif total_bytes >= _PIPELINE_2STEP_BYTES:
        min_steps = 2
    else:
        min_steps = 1
    if min_steps > 1:
        cap = (rows // min_steps) // min_sub * min_sub
        if cap >= min_sub:
            block_rows = min(block_rows, cap)
    return block_rows


def _make_lambda_kernel(func):
    def kernel(x_ref, o_ref):
        # Whole-tile elementwise apply on the VPU/EUP.  The last grid block
        # may be partial: its out-of-bounds rows hold undefined data that
        # flows through `func` and is discarded on store (harmless).
        o_ref[...] = func(x_ref[...]).astype(o_ref.dtype)
    return kernel


def _pallas_elementwise_2d(func, x2d, out_dtype, min_sub, eqns_per_elt, trans_per_elt):
    rows, width = x2d.shape
    in_isize = jnp.dtype(x2d.dtype).itemsize
    out_isize = jnp.dtype(out_dtype).itemsize
    target_block_bytes, vmem_limit = _generation_params()
    block_rows = _choose_block_rows(rows, width, in_isize, out_isize,
                                    min_sub, target_block_bytes)
    grid = (pl.cdiv(rows, block_rows),)
    n = rows * width
    cost = pl.CostEstimate(
        flops=int(eqns_per_elt) * n,
        transcendentals=int(trans_per_elt) * n,
        bytes_accessed=n * (in_isize + out_isize))
    return pl.pallas_call(
        _make_lambda_kernel(func),
        out_shape=jax.ShapeDtypeStruct((rows, width), out_dtype),
        grid=grid,
        in_specs=[pl.BlockSpec((block_rows, width), lambda i: (i, 0))],
        out_specs=pl.BlockSpec((block_rows, width), lambda i: (i, 0)),
        compiler_params=pltpu.CompilerParams(
            dimension_semantics=("parallel",),
            vmem_limit_bytes=vmem_limit),
        cost_estimate=cost,
    )(x2d)


def pallas_lambda_apply(func, x):
    """Apply `func` elementwise to `x` via a Pallas TPU kernel.

    Non-elementwise lambdas (reshapes/views, reductions, funcs capturing
    non-scalar arrays) are executed with plain JAX to preserve semantics.
    """
    orig_shape = x.shape
    n = x.size
    ok, out_dtype, eqns_per_elt, trans_per_elt = _analyze_func(func, x)
    if not ok or n < _LANE:
        # TODO(synk): reshape-only / reducing / position-dependent lambdas
        # (e.g. x.view(-1, 1, 28, 28)) have no tile-wise kernel contract; they
        # are handled in plain JAX here.
        return func(x)

    min_sub = max(_min_sublanes(x.dtype), _min_sublanes(out_dtype))
    flat = x.reshape(-1)
    bulk = (n // _LANE) * _LANE

    if bulk == n:
        # Aligned fast path: zero-copy 2-D view, no pad / slice at all.
        rows, width = _choose_layout(n // _LANE, min_sub)
        out2d = _pallas_elementwise_2d(func, flat.reshape(rows, width),
                                       out_dtype, min_sub,
                                       eqns_per_elt, trans_per_elt)
        return out2d.reshape(orig_shape)

    # Ragged path: run the 128-aligned bulk through the kernel and the tiny
    # (<128 element) tail in plain jnp, instead of padding + re-slicing the
    # whole tensor through HBM.
    rows, width = _choose_layout(bulk // _LANE, min_sub)
    out_bulk = _pallas_elementwise_2d(func, flat[:bulk].reshape(rows, width),
                                      out_dtype, min_sub,
                                      eqns_per_elt, trans_per_elt)
    out_tail = func(flat[bulk:]).astype(out_dtype)
    out_flat = jnp.concatenate([out_bulk.reshape(-1), out_tail])
    return out_flat.reshape(orig_shape)


class Lambda:
    """JAX/Pallas equivalent of the PyTorch Lambda(nn.Module)."""

    def __init__(self, func):
        self.func = func

    def __call__(self, x):
        return pallas_lambda_apply(self.func, x)


if __name__ == "__main__":
    key = jax.random.PRNGKey(0)

    # Deterministic elementwise lambda, analogous to e.g.
    # Lambda(lambda x: torch.tanh(x) * 2.0 + 1.0) in PyTorch.
    func = lambda t: jnp.tanh(t) * 2.0 + 1.0
    module = Lambda(func)

    # 1) Main demo: NCHW batch=2, channels=4, spatial=16x16 -> 2048 elems.
    #    Lane-dense (8, 256) view: full (8,128) vregs, no pad, single block.
    x = jax.random.normal(key, (2, 4, 16, 16), dtype=jnp.float32)
    out = jax.block_until_ready(module(x))
    ref = func(x)
    assert out.shape == x.shape and out.dtype == ref.dtype
    assert jnp.allclose(out, ref, atol=1e-5, rtol=1e-5)

    # 2) Mid-size: 1Mi elements -> (512, 2048) view, >=4-step pipelined grid
    #    (double-buffered DMA overlap; shards across both v7x TensorCores).
    x_mid = jax.random.normal(jax.random.PRNGKey(1), (64, 256, 64),
                              dtype=jnp.float32)
    out_mid = jax.block_until_ready(module(x_mid))
    assert jnp.allclose(out_mid, func(x_mid), atol=1e-5, rtol=1e-5)

    # 3) Ragged size: 273 elems -> 256-elem bulk via the kernel + 17-elem
    #    tail in plain jnp (no full-tensor pad / output slice).
    x_odd = jax.random.normal(jax.random.PRNGKey(2), (3, 7, 13),
                              dtype=jnp.float32)
    out_odd = jax.block_until_ready(module(x_odd))
    assert out_odd.shape == x_odd.shape
    assert jnp.allclose(out_odd, func(x_odd), atol=1e-5, rtol=1e-5)

    # 4) Non-elementwise "view" lambda -> guarded plain-JAX fallback.
    view = Lambda(lambda t: t.reshape(-1, 16))
    xv = jax.random.normal(jax.random.PRNGKey(3), (4, 8, 16), dtype=jnp.float32)
    out_v = jax.block_until_ready(view(xv))
    assert out_v.shape == (32, 16)
    assert jnp.allclose(out_v, xv.reshape(-1, 16))

    print("KERNEL_OK")
</pallas_src>

<mosaic_0001>
module attributes {stable_mosaic.version = 11 : i64} {
  func.func @kernel(%arg0: i32, %arg1: memref<8x256xf32, #tpu.memory_space<vmem>>, %arg2: memref<8x256xf32, #tpu.memory_space<vmem>>) attributes {dimension_semantics = [#tpu.dimension_semantics<parallel>], iteration_bounds = array<i64: 1>, scalar_prefetch = 0 : i64, scratch_operands = 0 : i64, tpu.core_type = #tpu.core_type<tc>, window_params = [{transform_indices = @transform_0, window_bounds = array<i64: 8, 256>}, {transform_indices = @transform_1, window_bounds = array<i64: 8, 256>}]} {
    %c0 = arith.constant 0 : index
    %c0_0 = arith.constant 0 : index
    %0 = vector.load %arg1[%c0, %c0_0] : memref<8x256xf32, #tpu.memory_space<vmem>>, vector<8x256xf32>
    %1 = math.tanh %0 : vector<8x256xf32>
    %cst = arith.constant 2.000000e+00 : f32
    %2 = vector.broadcast %cst : f32 to vector<8x256xf32>
    %3 = arith.mulf %1, %2 : vector<8x256xf32>
    %cst_1 = arith.constant 1.000000e+00 : f32
    %4 = vector.broadcast %cst_1 : f32 to vector<8x256xf32>
    %5 = arith.addf %3, %4 : vector<8x256xf32>
    %c0_2 = arith.constant 0 : index
    %c0_3 = arith.constant 0 : index
    %6 = vector.load %arg2[%c0_2, %c0_3] : memref<8x256xf32, #tpu.memory_space<vmem>>, vector<8x256xf32>
    tpu.vector_store %arg2[%c0_2, %c0_3], %5 {strides = array<i32>} : memref<8x256xf32, #tpu.memory_space<vmem>>, vector<8x256xf32>,
    return
  }
  func.func @transform_0(%arg0: i32) -> (i32, i32) {
    %c0_i32 = arith.constant 0 : i32
    %c0_i32_0 = arith.constant 0 : i32
    return %arg0, %c0_i32 : i32, i32
  }
  func.func @transform_1(%arg0: i32) -> (i32, i32) {
    %c0_i32 = arith.constant 0 : i32
    %c0_i32_0 = arith.constant 0 : i32
    return %arg0, %c0_i32 : i32, i32
  }
}

</mosaic_0001>

<bundles_post_ra>
// kernel: tpu_custom_call.1
= control target key start
LH: loop header
LB: loop body
LE: loop exit
PB: predicated region body
PF: predicated region fallthrough
CT: control target
= control target key end

     0   :  { %6 = vsyncpa [#allocation3], 0  ;;  %s126_s0 = inlined_call_operand.hbm [shape: f32[8,256], index: 0, kind: input, shape index: {}]   ;;  %s127_s1 = inlined_call_operand.hbm [shape: f32[8,256], index: 1, kind: output, shape index: {}]  }
   0x1   :  { %7 = vsyncpa [#allocation4], 0  ;;  %s13_s8 = sshll.u32 %s126_s0, 4  ;;  %s108_s9 = smov [#allocation2]   ;;  %s14_s8 = int_to_ptr.hbm [resolvable:$true] %s13_s8 }
   0x2   :  { %s15_s10 = sshll.u32 %s108_s9, 4  ;;  %s16_s10 = int_to_ptr.vmem [resolvable:$true] %s15_s10 }
   0x3   :  { %18 = dma.hbm_to_vmem [thread:$0]  %s14_s8, 256, %s16_s10, [#allocation3]  }
   0x4   :  { %104 = dma.done.wait [#allocation3], 256  }
   0x5   :  { %105 = vsyncadd [#allocation3], 4294967040  ;;  %v23_v0 = vld [vmem:[#allocation2] sm:$0xff]  ;;  %v24_v1 = vld [vmem:[#allocation2 + $0x8] sm:$0xff]  ;;  %s109_s11 = smov [#allocation5]   ;;  %s40_s0 = sshll.u32 %s127_s1, 4  ;;  %s41_s0 = int_to_ptr.hbm [resolvable:$true] %s40_s0 }
   0x6   :  { %52 = vtanh.f32 %v23_v0  ;;  %s38_s12 = sshll.u32 %s109_s11, 4  ;;  %s39_s12 = int_to_ptr.vmem [resolvable:$true] %s38_s12 }
   0x7   :  { %54 = vtanh.f32 %v24_v1 }
   0xc   :  { %v53_v2 = vpop.eup %52 }
   0xd   :  { %v55_v3 = vpop.eup %54  ;;  %v27_v4 = vmul.f32 2.0, %v53_v2 }
   0xe   :  { %v28_v5 = vmul.f32 2.0, %v55_v3 }
   0xf   :  { %v29_v6 = vadd.f32 1.0, %v27_v4 }
  0x10   :  { %v30_v7 = vadd.f32 1.0, %v28_v5 }
  0x11   :  { %31 = vst [vmem:[#allocation5] sm:$0xff] %v29_v6 }
  0x12   :  { %32 = vst [vmem:[#allocation5 + $0x8] sm:$0xff] %v30_v7 }
  0x13   :  { %43 = dma.vmem_to_hbm [thread:$0]  %s39_s12, 256, %s41_s0, [#allocation4]  }
  0x14   :  { %106 = dma.done.wait [#allocation4], 256  }
  0x15   :  { %107 = vsyncadd [#allocation4], 4294967040 }
  0x16   :  { %48 = vsyncpa [#allocation3], 1 }
  0x17   :  { %49 = vsyncpa [#allocation4], 1 }

</bundles_post_ra>
